<compile_context>
chip_gen: v5e
topology: v5e:2x2
jax: 0.10.0
libtpu: 0.0.40
codegen_flags: <defaults>
</compile_context>

<pallas_src>
import jax
import jax.numpy as jnp
from jax.experimental import pallas as pl
from jax.experimental.pallas import tpu as pltpu


def _round_up(n, m):
    return ((n + m - 1) // m) * m


def _mlp_softmax_kernel(x_ref, w1_ref, b1_ref, w2_ref, b2_ref, w3_ref, b3_ref,
                        out_ref):
    # x_ref: [n_features, TB]  (batch on lanes)
    x = x_ref[...]

    h1 = jnp.dot(w1_ref[...], x, preferred_element_type=jnp.float32) + b1_ref[...]
    h1 = jnp.maximum(h1, 0.0)

    h2 = jnp.dot(w2_ref[...], h1, preferred_element_type=jnp.float32) + b2_ref[...]
    h2 = jnp.maximum(h2, 0.0)

    logits = jnp.dot(w3_ref[...], h2, preferred_element_type=jnp.float32) + b3_ref[...]

    # softmax over the action axis (axis 0 in this transposed layout == dim=1
    # in the original [batch, actions] layout), max-subtracted for stability.
    m = jnp.max(logits, axis=0, keepdims=True)
    e = jnp.exp(logits - m)
    denom = jnp.sum(e, axis=0, keepdims=True)
    # Exact divide (NOT approx reciprocal): probabilities must sum to 1.
    out_ref[...] = (e / denom).astype(out_ref.dtype)


def net_forward_t(x_t, params, *, batch_tile=65536, core_parallel=False):
    """Zero-layout-pass entry point.

    x_t: [n_features, batch_p] f32, batch_p a multiple of 128 (keep your
         producer in this layout to avoid the wrapper-side transpose/pad).
    Returns [n_actions, batch_p] f32 softmax probabilities (per column).
    """
    n_features, batch_p = x_t.shape
    hidden = params["W1"].shape[0]
    n_actions = params["W3"].shape[0]

    if batch_p % 128 != 0:
        raise ValueError("batch_p must be a multiple of 128 (lane width); "
                         "use net_forward() for ragged batches.")

    tb = min(_round_up(batch_tile, 128), batch_p)
    if batch_p % tb != 0:
        raise ValueError("batch_p must be divisible by the (128-rounded) "
                         "batch_tile; use net_forward() for ragged batches.")

    grid = (batch_p // tb,)
    const = lambda i: (0, 0)   # resident weights / biases: never re-fetched
    tiled = lambda i: (0, i)   # batch-tiled activations

    sem = pltpu.CORE_PARALLEL if core_parallel else "parallel"

    weight_bytes = 4 * (hidden * n_features + hidden
                        + hidden * hidden + hidden
                        + n_actions * hidden + n_actions)
    cost = pl.CostEstimate(
        flops=2 * batch_p * (n_features * hidden + hidden * hidden
                             + hidden * n_actions),
        transcendentals=batch_p * n_actions,
        bytes_accessed=4 * batch_p * (n_features + n_actions) + weight_bytes,
    )

    return pl.pallas_call(
        _mlp_softmax_kernel,
        out_shape=jax.ShapeDtypeStruct((n_actions, batch_p), jnp.float32),
        grid=grid,
        in_specs=[
            pl.BlockSpec((n_features, tb), tiled),      # x (transposed)
            pl.BlockSpec((hidden, n_features), const),  # W1
            pl.BlockSpec((hidden, 1), const),           # b1
            pl.BlockSpec((hidden, hidden), const),      # W2
            pl.BlockSpec((hidden, 1), const),           # b2
            pl.BlockSpec((n_actions, hidden), const),   # W3
            pl.BlockSpec((n_actions, 1), const),        # b3
        ],
        out_specs=pl.BlockSpec((n_actions, tb), tiled),
        compiler_params=pltpu.CompilerParams(
            dimension_semantics=(sem,),
            vmem_limit_bytes=32 * 1024 * 1024,          # safe on v5e/v6e/v7x
        ),
        cost_estimate=cost,
    )(x_t, params["W1"], params["b1"], params["W2"], params["b2"],
      params["W3"], params["b3"])


def net_forward(x, params, *, batch_tile=65536, core_parallel=False):
    """PyTorch-layout wrapper: x [batch, n_features] -> probs [batch, n_actions].

    The transpose/pad/slice here are layout plumbing only; performance-critical
    callers should feed net_forward_t directly in [features, batch] layout.
    """
    batch, _ = x.shape
    tb = _round_up(min(batch_tile, batch), 128)
    padded = _round_up(batch, tb)

    x_t = x.T  # [n_features, batch]
    if padded != batch:
        x_t = jnp.pad(x_t, ((0, 0), (0, padded - batch)))

    out_t = net_forward_t(x_t, params, batch_tile=tb,
                          core_parallel=core_parallel)
    out = out_t.T  # [padded, n_actions]
    if padded != batch:
        out = out[:batch]
    return out


def init_params(key, n_features, n_actions, hidden=10):
    # Mirrors Net.init_weight(): weight ~ N(0, 0.3), bias = 0.1.
    # PyTorch-native layout: W is [out, in], b is [out, 1].
    k1, k2, k3 = jax.random.split(key, 3)
    return {
        "W1": 0.3 * jax.random.normal(k1, (hidden, n_features), jnp.float32),
        "b1": jnp.full((hidden, 1), 0.1, jnp.float32),
        "W2": 0.3 * jax.random.normal(k2, (hidden, hidden), jnp.float32),
        "b2": jnp.full((hidden, 1), 0.1, jnp.float32),
        "W3": 0.3 * jax.random.normal(k3, (n_actions, hidden), jnp.float32),
        "b3": jnp.full((n_actions, 1), 0.1, jnp.float32),
    }


def net_forward_ref(x, p):
    # Plain-JAX reference (standard [batch, features] layout).
    h1 = jnp.maximum(x @ p["W1"].T + p["b1"].T, 0.0)
    h2 = jnp.maximum(h1 @ p["W2"].T + p["b2"].T, 0.0)
    logits = h2 @ p["W3"].T + p["b3"].T
    return jax.nn.softmax(logits, axis=1)


if __name__ == "__main__":
    n_features, n_actions = 4, 2
    key = jax.random.PRNGKey(0)
    kx, kp = jax.random.split(key)
    params = init_params(kp, n_features, n_actions)

    # 1) Small single-block case (whole batch fits one 128-rounded tile).
    batch = 8
    x = jax.random.normal(kx, (batch, n_features), jnp.float32)
    out = jax.block_until_ready(net_forward(x, params))
    ref = net_forward_ref(x, params)
    assert out.shape == (batch, n_actions)
    assert jnp.allclose(out, ref, atol=1e-4, rtol=1e-4)
    assert jnp.allclose(jnp.sum(out, axis=1), jnp.ones((batch,)), atol=1e-4)

    # 2) Multi-tile gridded case with a ragged batch (pad + slice path):
    #    300 rows, 128-wide batch tiles -> grid=(3,).
    batch2 = 300
    x2 = jax.random.normal(kx, (batch2, n_features), jnp.float32)
    out2 = jax.block_until_ready(net_forward(x2, params, batch_tile=128))
    ref2 = net_forward_ref(x2, params)
    assert out2.shape == (batch2, n_actions)
    assert jnp.allclose(out2, ref2, atol=1e-4, rtol=1e-4)
    assert jnp.allclose(jnp.sum(out2, axis=1), jnp.ones((batch2,)), atol=1e-4)

    # 3) Zero-layout-pass transposed entry point (no x.T / pad / out.T in HBM).
    batch3 = 256
    x3_t = jax.random.normal(kx, (n_features, batch3), jnp.float32)
    out3_t = jax.block_until_ready(net_forward_t(x3_t, params))
    ref3 = net_forward_ref(x3_t.T, params)
    assert out3_t.shape == (n_actions, batch3)
    assert jnp.allclose(out3_t.T, ref3, atol=1e-4, rtol=1e-4)
    assert jnp.allclose(jnp.sum(out3_t, axis=0), jnp.ones((batch3,)), atol=1e-4)

    print("KERNEL_OK")
</pallas_src>

<mosaic_0001>
module attributes {stable_mosaic.version = 11 : i64} {
  func.func @_mlp_softmax_kernel(%arg0: i32, %arg1: memref<4x128xf32, #tpu.memory_space<vmem>>, %arg2: memref<10x4xf32, #tpu.memory_space<vmem>>, %arg3: memref<10x1xf32, #tpu.memory_space<vmem>>, %arg4: memref<10x10xf32, #tpu.memory_space<vmem>>, %arg5: memref<10x1xf32, #tpu.memory_space<vmem>>, %arg6: memref<2x10xf32, #tpu.memory_space<vmem>>, %arg7: memref<2x1xf32, #tpu.memory_space<vmem>>, %arg8: memref<2x128xf32, #tpu.memory_space<vmem>>) attributes {dimension_semantics = [#tpu.dimension_semantics<parallel>], iteration_bounds = array<i64: 1>, scalar_prefetch = 0 : i64, scratch_operands = 0 : i64, tpu.core_type = #tpu.core_type<tc>, window_params = [{transform_indices = @transform_0, window_bounds = array<i64: 4, 128>}, {pipeline_mode = #tpu.pipeline_mode<synchronous>, transform_indices = @transform_1, window_bounds = array<i64: 10, 4>}, {pipeline_mode = #tpu.pipeline_mode<synchronous>, transform_indices = @transform_2, window_bounds = array<i64: 10, 1>}, {pipeline_mode = #tpu.pipeline_mode<synchronous>, transform_indices = @transform_3, window_bounds = array<i64: 10, 10>}, {pipeline_mode = #tpu.pipeline_mode<synchronous>, transform_indices = @transform_4, window_bounds = array<i64: 10, 1>}, {pipeline_mode = #tpu.pipeline_mode<synchronous>, transform_indices = @transform_5, window_bounds = array<i64: 2, 10>}, {pipeline_mode = #tpu.pipeline_mode<synchronous>, transform_indices = @transform_6, window_bounds = array<i64: 2, 1>}, {transform_indices = @transform_7, window_bounds = array<i64: 2, 128>}]} {
    %c0 = arith.constant 0 : index
    %c0_0 = arith.constant 0 : index
    %0 = vector.load %arg1[%c0, %c0_0] : memref<4x128xf32, #tpu.memory_space<vmem>>, vector<4x128xf32>
    %c0_1 = arith.constant 0 : index
    %c0_2 = arith.constant 0 : index
    %1 = vector.load %arg2[%c0_1, %c0_2] : memref<10x4xf32, #tpu.memory_space<vmem>>, vector<10x4xf32>
    %cst = arith.constant dense<0.000000e+00> : vector<10x128xf32>
    %2 = tpu.matmul %1, %0, %cst {dimension_numbers = #tpu.dot_dimension_numbers<[1], [0], [0], [1], [0, 0, 1, 1], [], []>} : vector<10x4xf32>, vector<4x128xf32>, vector<10x128xf32> -> vector<10x128xf32>
    %c0_3 = arith.constant 0 : index
    %c0_4 = arith.constant 0 : index
    %3 = vector.load %arg3[%c0_3, %c0_4] : memref<10x1xf32, #tpu.memory_space<vmem>>, vector<10x1xf32>
    %4 = vector.broadcast %3 : vector<10x1xf32> to vector<10x128xf32>
    %5 = arith.addf %2, %4 : vector<10x128xf32>
    %cst_5 = arith.constant 0.000000e+00 : f32
    %6 = vector.broadcast %cst_5 : f32 to vector<10x128xf32>
    %7 = arith.maximumf %5, %6 : vector<10x128xf32>
    %c0_6 = arith.constant 0 : index
    %c0_7 = arith.constant 0 : index
    %8 = vector.load %arg4[%c0_6, %c0_7] : memref<10x10xf32, #tpu.memory_space<vmem>>, vector<10x10xf32>
    %cst_8 = arith.constant dense<0.000000e+00> : vector<10x128xf32>
    %9 = tpu.matmul %8, %7, %cst_8 {dimension_numbers = #tpu.dot_dimension_numbers<[1], [0], [0], [1], [0, 0, 1, 1], [], []>} : vector<10x10xf32>, vector<10x128xf32>, vector<10x128xf32> -> vector<10x128xf32>
    %c0_9 = arith.constant 0 : index
    %c0_10 = arith.constant 0 : index
    %10 = vector.load %arg5[%c0_9, %c0_10] : memref<10x1xf32, #tpu.memory_space<vmem>>, vector<10x1xf32>
    %11 = vector.broadcast %10 : vector<10x1xf32> to vector<10x128xf32>
    %12 = arith.addf %9, %11 : vector<10x128xf32>
    %cst_11 = arith.constant 0.000000e+00 : f32
    %13 = vector.broadcast %cst_11 : f32 to vector<10x128xf32>
    %14 = arith.maximumf %12, %13 : vector<10x128xf32>
    %c0_12 = arith.constant 0 : index
    %c0_13 = arith.constant 0 : index
    %15 = vector.load %arg6[%c0_12, %c0_13] : memref<2x10xf32, #tpu.memory_space<vmem>>, vector<2x10xf32>
    %cst_14 = arith.constant dense<0.000000e+00> : vector<2x128xf32>
    %16 = tpu.matmul %15, %14, %cst_14 {dimension_numbers = #tpu.dot_dimension_numbers<[1], [0], [0], [1], [0, 0, 1, 1], [], []>} : vector<2x10xf32>, vector<10x128xf32>, vector<2x128xf32> -> vector<2x128xf32>
    %c0_15 = arith.constant 0 : index
    %c0_16 = arith.constant 0 : index
    %17 = vector.load %arg7[%c0_15, %c0_16] : memref<2x1xf32, #tpu.memory_space<vmem>>, vector<2x1xf32>
    %18 = vector.broadcast %17 : vector<2x1xf32> to vector<2x128xf32>
    %19 = arith.addf %16, %18 : vector<2x128xf32>
    %cst_17 = arith.constant dense<0xFF800000> : vector<128xf32>
    %20 = vector.multi_reduction <maximumf>, %19, %cst_17 [0] : vector<2x128xf32> to vector<128xf32>
    %21 = vector.shape_cast %20 : vector<128xf32> to vector<1x128xf32>
    %22 = vector.broadcast %21 : vector<1x128xf32> to vector<2x128xf32>
    %23 = arith.subf %19, %22 : vector<2x128xf32>
    %24 = math.exp %23 : vector<2x128xf32>
    %cst_18 = arith.constant dense<0.000000e+00> : vector<128xf32>
    %25 = vector.multi_reduction <add>, %24, %cst_18 [0] : vector<2x128xf32> to vector<128xf32>
    %26 = vector.shape_cast %25 : vector<128xf32> to vector<1x128xf32>
    %27 = vector.broadcast %26 : vector<1x128xf32> to vector<2x128xf32>
    %28 = arith.divf %24, %27 : vector<2x128xf32>
    %c0_19 = arith.constant 0 : index
    %c0_20 = arith.constant 0 : index
    %29 = vector.load %arg8[%c0_19, %c0_20] : memref<2x128xf32, #tpu.memory_space<vmem>>, vector<2x128xf32>
    tpu.vector_store %arg8[%c0_19, %c0_20], %28 {strides = array<i32>} : memref<2x128xf32, #tpu.memory_space<vmem>>, vector<2x128xf32>,
    return
  }
  func.func @transform_0(%arg0: i32) -> (i32, i32) {
    %c0_i32 = arith.constant 0 : i32
    %c0_i32_0 = arith.constant 0 : i32
    return %c0_i32, %arg0 : i32, i32
  }
  func.func @transform_1(%arg0: i32) -> (i32, i32) {
    %c0_i32 = arith.constant 0 : i32
    %c0_i32_0 = arith.constant 0 : i32
    %c0_i32_1 = arith.constant 0 : i32
    return %c0_i32, %c0_i32_0 : i32, i32
  }
  func.func @transform_2(%arg0: i32) -> (i32, i32) {
    %c0_i32 = arith.constant 0 : i32
    %c0_i32_0 = arith.constant 0 : i32
    %c0_i32_1 = arith.constant 0 : i32
    return %c0_i32, %c0_i32_0 : i32, i32
  }
  func.func @transform_3(%arg0: i32) -> (i32, i32) {
    %c0_i32 = arith.constant 0 : i32
    %c0_i32_0 = arith.constant 0 : i32
    %c0_i32_1 = arith.constant 0 : i32
    return %c0_i32, %c0_i32_0 : i32, i32
  }
  func.func @transform_4(%arg0: i32) -> (i32, i32) {
    %c0_i32 = arith.constant 0 : i32
    %c0_i32_0 = arith.constant 0 : i32
    %c0_i32_1 = arith.constant 0 : i32
    return %c0_i32, %c0_i32_0 : i32, i32
  }
  func.func @transform_5(%arg0: i32) -> (i32, i32) {
    %c0_i32 = arith.constant 0 : i32
    %c0_i32_0 = arith.constant 0 : i32
    %c0_i32_1 = arith.constant 0 : i32
    return %c0_i32, %c0_i32_0 : i32, i32
  }
  func.func @transform_6(%arg0: i32) -> (i32, i32) {
    %c0_i32 = arith.constant 0 : i32
    %c0_i32_0 = arith.constant 0 : i32
    %c0_i32_1 = arith.constant 0 : i32
    return %c0_i32, %c0_i32_0 : i32, i32
  }
  func.func @transform_7(%arg0: i32) -> (i32, i32) {
    %c0_i32 = arith.constant 0 : i32
    %c0_i32_0 = arith.constant 0 : i32
    return %c0_i32, %arg0 : i32, i32
  }
}

</mosaic_0001>

<bundles_post_ra>
// kernel: tpu_custom_call.1
= control target key start
LH: loop header
LB: loop body
LE: loop exit
PB: predicated region body
PF: predicated region fallthrough
CT: control target
= control target key end

     0   :  { %vm49_vm0 = vcmask 1043456   ;;  %vm42_vm1 = vcmask 31744   ;;  %v255_v2 = vmov 0   ;;  %s341_s0 = inlined_call_operand.vmem [shape: f32[4,128], index: 0, kind: input, shape index: {}]   ;;  %s342_s1 = inlined_call_operand.vmem [shape: f32[10,4], index: 1, kind: input, shape index: {}]   ;;  %s343_s2 = inlined_call_operand.vmem [shape: f32[10,1], index: 2, kind: input, shape index: {}]   ;;  %s344_s3 = inlined_call_operand.vmem [shape: f32[10,10], index: 3, kind: input, shape index: {}]   ;;  %s345_s4 = inlined_call_operand.vmem [shape: f32[10,1], index: 4, kind: input, shape index: {}]   ;;  %s346_s5 = inlined_call_operand.vmem [shape: f32[2,10], index: 5, kind: input, shape index: {}]   ;;  %s347_s6 = inlined_call_operand.vmem [shape: f32[2,1], index: 6, kind: input, shape index: {}]   ;;  %s348_s7 = inlined_call_operand.hbm [shape: f32[2,128], index: 7, kind: output, shape index: {}]  }
   0x1   :  { %v27_v0 = vld [vmem:[%s341_s0] sm:$0xf]  ;;  %222 = vset.pattern.permute.xlu0 %v255_v2  ;;  %v31_v3 = vld [vmem:[%s343_s2 + $0x8] sm:$0x3] }
   0x2   :  { %v28_v1 = vld [vmem:[%s342_s1] sm:$0xff]  ;;  %210 = vmatpush.msk.msra.mxu0 %vm49_vm0, %v27_v0  ;;  %39 = vperm.xlu0 %222, %v31_v3  }
   0x3   :  { %211 = vmatmul.msk.f32.vlgmr.msra.gmra.mxu0 %vm42_vm1, %v28_v1 }
   0x4   :  { %12 = vsyncpa [#allocation3], 0  ;;  %223 = vset.pattern.permute.xlu1 %v255_v2  ;;  %224 = vset.pattern.permute.xlu2 %v255_v2  ;;  %v29_v4 = vld [vmem:[%s342_s1 + $0x8] sm:$0x3]  ;;  %v30_v5 = vld [vmem:[%s343_s2] sm:$0xff]  ;;  %vm99_vm2 = vcmask 1041408  }
   0x5   :  { %v81_v6 = vld [vmem:[%s345_s4 + $0x8] sm:$0x3]  ;;  %v80_v7 = vld [vmem:[%s345_s4] sm:$0xff]  ;;  %vm92_vm3 = vcmask 80896   ;;  %s201_s20 = sshll.u32 %s348_s7, 4  ;;  %s202_s20 = int_to_ptr.hbm [resolvable:$true] %s201_s20 }
   0x6   :  { %89 = vperm.xlu1 %223, %v81_v6   ;;  %v78_v16 = vld [vmem:[%s344_s3] sm:$0xff]  ;;  %v79_v17 = vld [vmem:[%s344_s3 + $0x8] sm:$0x3] }
   0x7   :  { %v129_v18 = vld [vmem:[%s347_s6] sm:$0x3] }
   0x8   :  { %132 = vperm.xlu2 %224, %v129_v18   ;;  %v128_v27 = vld [vmem:[%s346_s5] sm:$0x3]  ;;  %s256_s5 = smov [#allocation2]  }
   0x9   :  { %s199_s6 = sshll.u32 %s256_s5, 4  ;;  %s200_s6 = int_to_ptr.vmem [resolvable:$true] %s199_s6 }
   0xa   :  { %34 = vperm.xlu0 %222, %v30_v5  }
   0xb   :  { %212 = vmatmul.msk.f32.gmra.mxu0 %vm42_vm1, %v29_v4 }
   0xe   :  { %84 = vperm.xlu1 %223, %v80_v7  }
  0x62   :  { %v133_v28 = vpop.permute.xlu2 %132 }
  0x74   :  { %v40_v8 = vpop.permute.xlu0 %39 }
  0x78   :  { %v90_v19 = vpop.permute.xlu1 %89 }
  0x7c   :  { %v35_v10 = vpop.permute.xlu0 %34 }
  0x80   :  { %v70_v9 = vpop.f32.mrf.mxu0  ;;  %v85_v20 = vpop.permute.xlu1 %84 }
  0x81   :  { %v71_v12 = vadd.f32 %v70_v9, %v35_v10 }
  0x83   :  { %v76_v15 = vmax.f32 %v71_v12, 0.0 }
  0x88   :  { %v73_v11 = vpop.f32.mrf.mxu0 }
  0x89   :  { %v74_v13 = vadd.f32 %v73_v11, %v40_v8 }
  0x8b   :  { %v77_v14 = vmax.f32 %v74_v13, 0.0 }
  0x8d   :  { %213 = vmatpush.msk.msra.mxu1 %vm99_vm2, %v77_v14  ;;  %218 = vmatpush.msk.msra.mxu3 %vm99_vm2, %v77_v14 }
  0x8f   :  { %118 = vmatpush.msra.mxu1 %v76_v15  ;;  %219 = vmatpush.msra.mxu3 %v76_v15 }
  0x90   :  { %214 = vmatmul.msk.f32.vlgmr.msra.gmra.mxu1 %vm92_vm3, %v78_v16  ;;  %215 = vmatmul.msk.f32.vlgmr.msra.gmra.mxu3 %vm92_vm3, %v79_v17 }
 0x10d   :  { %v120_v21 = vpop.f32.mrf.mxu1 }
 0x10e   :  { %v121_v23 = vadd.f32 %v120_v21, %v85_v20 }
 0x110   :  { %v126_v26 = vmax.f32 %v121_v23, 0.0 }
 0x113   :  { %v123_v22 = vpop.f32.mrf.mxu3 }
 0x114   :  { %v124_v24 = vadd.f32 %v123_v22, %v90_v19 }
 0x116   :  { %v127_v25 = vmax.f32 %v124_v24, 0.0 }
 0x118   :  { %216 = vmatpush.msk.msra.mxu2 %vm99_vm2, %v127_v25 }
 0x11a   :  { %156 = vmatpush.msra.mxu2 %v126_v26 }
 0x11b   :  { %217 = vmatmul.msk.f32.vlgmr.msra.gmra.mxu2 %vm92_vm3, %v128_v27 }
 0x19e   :  { %v158_v29 = vpop.f32.mrf.mxu2 }
 0x19f   :  { %v159_v30 = vadd.f32 %v158_v29, %v133_v28 }
 0x1a1   :  { %v161_v31 = vsel %vm99_vm2, %v159_v30, -inf }
 0x1a2   :  { %v162_v32 = vrot.slane %v161_v31, 4 }
 0x1a4   :  { %v163_v33 = vmax.f32 %v161_v31, %v162_v32 }
 0x1a6   :  { %v164_v34 = vrot.slane %v163_v33, 2 }
 0x1a8   :  { %v165_v35 = vmax.f32 %v163_v33, %v164_v34 }
 0x1aa   :  { %v166_v36 = vrot.slane %v165_v35, 1 }
 0x1ac   :  { %v167_v37 = vmax.f32 %v165_v35, %v166_v36 }
 0x1ae   :  { %v168_v38 = vsub.f32 %v159_v30, %v167_v37 }
 0x1b0   :  { %v169_v39 = vmul.f32 1.442695, %v168_v38 }
 0x1b2   :  { %225 = vpow2.f32 %v169_v39 }
 0x1b8   :  { %v226_v40 = vpop.eup %225 }
 0x1b9   :  { %v171_v41 = vsel %vm99_vm2, %v226_v40, 0.0 }
 0x1ba   :  { %v172_v42 = vrot.slane %v171_v41, 4 }
 0x1bc   :  { %v173_v43 = vadd.f32 %v172_v42, %v171_v41 }
 0x1be   :  { %v174_v44 = vrot.slane %v173_v43, 2 }
 0x1c0   :  { %v175_v45 = vadd.f32 %v174_v44, %v173_v43 }
 0x1c2   :  { %v176_v46 = vrot.slane %v175_v45, 1 }
 0x1c4   :  { %v177_v47 = vadd.f32 %v176_v46, %v175_v45 }
 0x1c6   :  { %227 = vrcp.f32 %v177_v47  ;;  %v189_v51 = vand.u32 2147483648, %v177_v47  ;;  %v187_v53 = vand.u32 2147483647, %v177_v47  ;;  %vm183_vm5 = vweird.f32 %v177_v47 }
 0x1c8   :  { %v190_v55 = vor.u32 1.1754944e-38, %v189_v51  ;;  %vm188_vm7 = vcmp.eq.f32.partialorder %v187_v53, 8.507059e+37 }
 0x1cc   :  { %v228_v48 = vpop.eup %227 }
 0x1cd   :  { %v179_v49 = vmul.f32 %v228_v48, %v177_v47  ;;  %vm184_vm4 = vweird.f32 %v228_v48 }
 0x1ce   :  { %vm185_vm6 = vmor %vm183_vm5, %vm184_vm4 }
 0x1cf   :  { %v180_v50 = vsub.f32 1.0, %v179_v49 }
 0x1d1   :  { %v181_v52 = vmul.f32 %v228_v48, %v180_v50 }
 0x1d3   :  { %v182_v54 = vadd.f32 %v228_v48, %v181_v52 }
 0x1d5   :  { %v186_v56 = vsel %vm185_vm6, %v228_v48, %v182_v54 }
 0x1d6   :  { %v191_v57 = vsel %vm188_vm7, %v190_v55, %v186_v56 }
 0x1d7   :  { %v192_v58 = vmul.f32 %v226_v40, %v191_v57 }
 0x1d9   :  { %193 = vst [vmem:[#allocation2] sm:$0x3] %v192_v58 }
 0x1da   :  { %204 = dma.vmem_to_hbm [thread:$0]  %s200_s6, 32, %s202_s20, [#allocation3]  }
 0x1db   :  { %253 = dma.done.wait [#allocation3], 32  }
 0x1dc   :  { %254 = vsyncadd [#allocation3], 4294967264 }
 0x1dd   :  { %209 = vsyncpa [#allocation3], 1 }

</bundles_post_ra>
